<compile_context>
chip_gen: v7x
topology: tpu7x:2x2x1
jax: 0.10.0
libtpu: 0.0.40
codegen_flags: <defaults>
</compile_context>

<pallas_src>
import functools

import jax
import jax.numpy as jnp
from jax.experimental import pallas as pl
from jax.experimental.pallas import tpu as pltpu


_NEG_LARGE = -1e30  # class-axis padding value (exp(pad - max) underflows to 0)


def _round_up(x, m):
    return ((x + m - 1) // m) * m


def _f1_loss_kernel(pred_ref, label_ref, out_ref,
                    tp_acc, colsum_acc, count_acc,
                    *, classes, epsilon, n_valid):
    # pred_ref : (c_pad, tile_n) f32 logits, classes on sublanes, batch on lanes
    # label_ref: (1, tile_n) i32 class ids (batch padding columns hold -1)
    c_pad, tile_n = pred_ref.shape
    step = pl.program_id(0)

    @pl.when(step == 0)
    def _init():
        tp_acc[...] = jnp.zeros_like(tp_acc)
        colsum_acc[...] = jnp.zeros_like(colsum_acc)
        count_acc[...] = jnp.zeros_like(count_acc)
        out_ref[0, 0] = 0.0

    logits = pred_ref[...]                                     # (c_pad, tile_n)
    labels = label_ref[...]                                    # (1, tile_n)

    # Softmax across the (sublane) class axis; padded class rows hold -1e30 so
    # they contribute ~zero probability mass.
    m = jnp.max(logits, axis=0, keepdims=True)                 # (1, tile_n)
    e = jnp.exp(logits - m)                                    # (c_pad, tile_n)
    inv_denom = pl.reciprocal(jnp.sum(e, axis=0, keepdims=True), approx=False)
    p = e * inv_denom                                          # (c_pad, tile_n)

    # one-hot(labels) via sublane-iota compare; padded columns carry label -1
    # and therefore match no class (so tp/count need no extra masking).
    class_ids = jax.lax.broadcasted_iota(jnp.int32, (c_pad, tile_n), 0)
    onehot = (labels == class_ids).astype(jnp.float32)          # (c_pad, tile_n)

    # Validity mask for batch-padding columns (only colsum needs it).
    col = jax.lax.broadcasted_iota(jnp.int32, (1, tile_n), 1) + step * tile_n
    valid = (col < n_valid).astype(jnp.float32)                 # (1, tile_n)

    # Per-lane running accumulators (lane reduction deferred to the epilogue).
    tp_acc[...] += onehot * p
    colsum_acc[...] += p * valid          # == per-class (tp + fp) contributions
    count_acc[...] += onehot              # == per-class (tp + fn) contributions

    @pl.when(step == pl.num_programs(0) - 1)
    def _finalize():
        tp = jnp.sum(tp_acc[...], axis=1, keepdims=True)         # (c_pad, 1)
        colsum = jnp.sum(colsum_acc[...], axis=1, keepdims=True)  # tp + fp
        count = jnp.sum(count_acc[...], axis=1, keepdims=True)    # tp + fn
        precision = tp / (colsum + epsilon)
        recall = tp / (count + epsilon)
        f1 = 2.0 * (precision * recall) / (precision + recall + epsilon)
        f1 = jnp.clip(f1, epsilon, 1.0 - epsilon)
        cmask = (jax.lax.broadcasted_iota(jnp.int32, (c_pad, 1), 0)
                 < classes).astype(jnp.float32)
        out_ref[0, 0] = 1.0 - jnp.sum(f1 * cmask) / classes


def f1_loss_3(y_pred, y_true, *, classes=3, epsilon=1e-7, max_tile_n=2048):
    """Pallas-TPU equivalent of F1Loss_3.forward(y_pred, y_true)."""
    assert y_pred.ndim == 2
    assert y_true.ndim == 1
    n, c = y_pred.shape
    assert c == classes
    assert y_true.shape[0] == n

    c_pad = _round_up(max(classes, 1), 8)

    # Lane-dense layout: classes -> sublanes (padded with -1e30), batch -> lanes.
    pred_t = jnp.transpose(y_pred.astype(jnp.float32))                 # (C, N)
    pred_t = jnp.pad(pred_t, ((0, c_pad - classes), (0, 0)),
                     constant_values=_NEG_LARGE)                       # (c_pad, N)

    tile_n = min(max_tile_n, _round_up(n, 128))
    n_pad = _round_up(n, tile_n)
    labels = y_true.astype(jnp.int32)
    if n_pad > n:
        pred_t = jnp.pad(pred_t, ((0, 0), (0, n_pad - n)))
        labels = jnp.pad(labels, (0, n_pad - n), constant_values=-1)
    labels_2d = labels.reshape(1, n_pad)
    n_tiles = n_pad // tile_n

    kernel = functools.partial(_f1_loss_kernel, classes=classes,
                               epsilon=float(epsilon), n_valid=n)

    # TODO(synk): for very large N on v7x, add a leading "parallel" grid axis to
    # split the batch stream across the two TensorCores with a tiny second-stage
    # combine of (tp, colsum, count).
    out = pl.pallas_call(
        kernel,
        out_shape=jax.ShapeDtypeStruct((1, 1), jnp.float32),
        grid_spec=pltpu.PrefetchScalarGridSpec(
            num_scalar_prefetch=0,
            grid=(n_tiles,),
            in_specs=[
                pl.BlockSpec((c_pad, tile_n), lambda i: (0, i)),
                pl.BlockSpec((1, tile_n), lambda i: (0, i)),
            ],
            out_specs=pl.BlockSpec((1, 1), lambda i: (0, 0),
                                   memory_space=pltpu.MemorySpace.SMEM),
            scratch_shapes=[
                pltpu.VMEM((c_pad, tile_n), jnp.float32),  # tp accumulator
                pltpu.VMEM((c_pad, tile_n), jnp.float32),  # colsum (tp+fp)
                pltpu.VMEM((c_pad, tile_n), jnp.float32),  # count  (tp+fn)
            ],
        ),
        compiler_params=pltpu.CompilerParams(
            dimension_semantics=("arbitrary",)),
    )(pred_t, labels_2d)
    return out[0, 0]


def _reference(y_pred, y_true, classes=3, epsilon=1e-7):
    # Pure-JAX reference mirroring the torch code (tn computed but unused there).
    y_true_oh = jax.nn.one_hot(y_true, classes, dtype=jnp.float32)
    p = jax.nn.softmax(y_pred.astype(jnp.float32), axis=1)
    tp = jnp.sum(y_true_oh * p, axis=0)
    fp = jnp.sum((1 - y_true_oh) * p, axis=0)
    fn = jnp.sum(y_true_oh * (1 - p), axis=0)
    precision = tp / (tp + fp + epsilon)
    recall = tp / (tp + fn + epsilon)
    f1 = 2 * (precision * recall) / (precision + recall + epsilon)
    f1 = jnp.clip(f1, epsilon, 1 - epsilon)
    return 1 - jnp.mean(f1)


if __name__ == "__main__":
    classes = 3
    epsilon = 1e-7

    # Small demo shape consistent with the module spec.
    batch = 16
    k_pred, k_true = jax.random.split(jax.random.PRNGKey(0))
    y_pred = jax.random.normal(k_pred, (batch, classes), dtype=jnp.float32)
    y_true = jax.random.randint(k_true, (batch,), 0, classes, dtype=jnp.int32)

    loss = f1_loss_3(y_pred, y_true, classes=classes, epsilon=epsilon)
    jax.block_until_ready(loss)
    ref = _reference(y_pred, y_true, classes=classes, epsilon=epsilon)
    assert jnp.allclose(loss, ref, atol=1e-5, rtol=1e-5), (loss, ref)

    # Multi-tile + masked-tail path (exercises the grid accumulators).
    batch2 = 400
    k_pred2, k_true2 = jax.random.split(jax.random.PRNGKey(1))
    y_pred2 = jax.random.normal(k_pred2, (batch2, classes), dtype=jnp.float32)
    y_true2 = jax.random.randint(k_true2, (batch2,), 0, classes, dtype=jnp.int32)
    loss2 = f1_loss_3(y_pred2, y_true2, classes=classes, epsilon=epsilon,
                      max_tile_n=128)
    jax.block_until_ready(loss2)
    ref2 = _reference(y_pred2, y_true2, classes=classes, epsilon=epsilon)
    assert jnp.allclose(loss2, ref2, atol=1e-5, rtol=1e-5), (loss2, ref2)

    print("KERNEL_OK")
</pallas_src>

<mosaic_0001>
module attributes {stable_mosaic.version = 11 : i64} {
  func.func @_f1_loss_kernel(%arg0: i32, %arg1: memref<8x128xf32, #tpu.memory_space<vmem>>, %arg2: memref<1x128xi32, #tpu.memory_space<vmem>>, %arg3: memref<1x1xf32, #tpu.memory_space<smem>>, %arg4: memref<8x128xf32, #tpu.memory_space<vmem>>, %arg5: memref<8x128xf32, #tpu.memory_space<vmem>>, %arg6: memref<8x128xf32, #tpu.memory_space<vmem>>) attributes {dimension_semantics = [#tpu.dimension_semantics<arbitrary>], iteration_bounds = array<i64: 1>, scalar_prefetch = 0 : i64, scratch_operands = 3 : i64, tpu.core_type = #tpu.core_type<tc>, window_params = [{transform_indices = @transform_0, window_bounds = array<i64: 8, 128>}, {transform_indices = @transform_1, window_bounds = array<i64: 1, 128>}, {transform_indices = @transform_2, window_bounds = array<i64: 1, 1>}]} {
    %c0_i32 = arith.constant 0 : i32
    %0 = arith.cmpi eq, %arg0, %c0_i32 : i32
    %1 = arith.extui %0 : i1 to i32
    %c0_i32_0 = arith.constant 0 : i32
    %2 = arith.cmpi ne, %1, %c0_i32_0 : i32
    scf.if %2 {
      %cst_19 = arith.constant 0.000000e+00 : f32
      %43 = vector.broadcast %cst_19 : f32 to vector<8x128xf32>
      %c0_20 = arith.constant 0 : index
      %c0_21 = arith.constant 0 : index
      %44 = vector.load %arg4[%c0_20, %c0_21] : memref<8x128xf32, #tpu.memory_space<vmem>>, vector<8x128xf32>
      tpu.vector_store %arg4[%c0_20, %c0_21], %43 {strides = array<i32>} : memref<8x128xf32, #tpu.memory_space<vmem>>, vector<8x128xf32>,
      %cst_22 = arith.constant 0.000000e+00 : f32
      %45 = vector.broadcast %cst_22 : f32 to vector<8x128xf32>
      %c0_23 = arith.constant 0 : index
      %c0_24 = arith.constant 0 : index
      %46 = vector.load %arg5[%c0_23, %c0_24] : memref<8x128xf32, #tpu.memory_space<vmem>>, vector<8x128xf32>
      tpu.vector_store %arg5[%c0_23, %c0_24], %45 {strides = array<i32>} : memref<8x128xf32, #tpu.memory_space<vmem>>, vector<8x128xf32>,
      %cst_25 = arith.constant 0.000000e+00 : f32
      %47 = vector.broadcast %cst_25 : f32 to vector<8x128xf32>
      %c0_26 = arith.constant 0 : index
      %c0_27 = arith.constant 0 : index
      %48 = vector.load %arg6[%c0_26, %c0_27] : memref<8x128xf32, #tpu.memory_space<vmem>>, vector<8x128xf32>
      tpu.vector_store %arg6[%c0_26, %c0_27], %47 {strides = array<i32>} : memref<8x128xf32, #tpu.memory_space<vmem>>, vector<8x128xf32>,
      %cst_28 = arith.constant 0.000000e+00 : f32
      %c0_29 = arith.constant 0 : index
      %c0_30 = arith.constant 0 : index
      %49 = memref.load %arg3[%c0_29, %c0_30] : memref<1x1xf32, #tpu.memory_space<smem>>
      memref.store %cst_28, %arg3[%c0_29, %c0_30] : memref<1x1xf32, #tpu.memory_space<smem>>
    } else {
    }
    %c0 = arith.constant 0 : index
    %c0_1 = arith.constant 0 : index
    %3 = vector.load %arg1[%c0, %c0_1] : memref<8x128xf32, #tpu.memory_space<vmem>>, vector<8x128xf32>
    %c0_2 = arith.constant 0 : index
    %c0_3 = arith.constant 0 : index
    %4 = vector.load %arg2[%c0_2, %c0_3] : memref<1x128xi32, #tpu.memory_space<vmem>>, vector<1x128xi32>
    %cst = arith.constant dense<0xFF800000> : vector<128xf32>
    %5 = vector.multi_reduction <maximumf>, %3, %cst [0] : vector<8x128xf32> to vector<128xf32>
    %6 = vector.shape_cast %5 : vector<128xf32> to vector<1x128xf32>
    %7 = vector.broadcast %6 : vector<1x128xf32> to vector<8x128xf32>
    %8 = arith.subf %3, %7 : vector<8x128xf32>
    %9 = math.exp %8 : vector<8x128xf32>
    %cst_4 = arith.constant dense<0.000000e+00> : vector<128xf32>
    %10 = vector.multi_reduction <add>, %9, %cst_4 [0] : vector<8x128xf32> to vector<128xf32>
    %11 = vector.shape_cast %10 : vector<128xf32> to vector<1x128xf32>
    %12 = tpu.reciprocal %11 : vector<1x128xf32> -> vector<1x128xf32>
    %13 = vector.broadcast %12 : vector<1x128xf32> to vector<8x128xf32>
    %14 = arith.mulf %9, %13 : vector<8x128xf32>
    %15 = tpu.iota {dimensions = array<i32: 0>} : vector<8x128xi32>
    %16 = vector.broadcast %4 : vector<1x128xi32> to vector<8x128xi32>
    %17 = arith.cmpi eq, %16, %15 : vector<8x128xi32>
    %18 = arith.extui %17 : vector<8x128xi1> to vector<8x128xi32>
    %19 = arith.sitofp %18 : vector<8x128xi32> to vector<8x128xf32>
    %20 = tpu.iota {dimensions = array<i32: 1>} : vector<1x128xi32>
    %c128_i32 = arith.constant 128 : i32
    %21 = arith.muli %arg0, %c128_i32 : i32
    %22 = vector.broadcast %21 : i32 to vector<1x128xi32>
    %23 = arith.addi %20, %22 : vector<1x128xi32>
    %c16_i32 = arith.constant 16 : i32
    %24 = vector.broadcast %c16_i32 : i32 to vector<1x128xi32>
    %25 = arith.cmpi slt, %23, %24 : vector<1x128xi32>
    %26 = arith.extui %25 : vector<1x128xi1> to vector<1x128xi32>
    %27 = arith.sitofp %26 : vector<1x128xi32> to vector<1x128xf32>
    %c0_5 = arith.constant 0 : index
    %c0_6 = arith.constant 0 : index
    %28 = vector.load %arg4[%c0_5, %c0_6] : memref<8x128xf32, #tpu.memory_space<vmem>>, vector<8x128xf32>
    %29 = arith.mulf %19, %14 : vector<8x128xf32>
    %30 = arith.addf %28, %29 : vector<8x128xf32>
    %c0_7 = arith.constant 0 : index
    %c0_8 = arith.constant 0 : index
    %31 = vector.load %arg4[%c0_7, %c0_8] : memref<8x128xf32, #tpu.memory_space<vmem>>, vector<8x128xf32>
    tpu.vector_store %arg4[%c0_7, %c0_8], %30 {strides = array<i32>} : memref<8x128xf32, #tpu.memory_space<vmem>>, vector<8x128xf32>,
    %c0_9 = arith.constant 0 : index
    %c0_10 = arith.constant 0 : index
    %32 = vector.load %arg5[%c0_9, %c0_10] : memref<8x128xf32, #tpu.memory_space<vmem>>, vector<8x128xf32>
    %33 = vector.broadcast %27 : vector<1x128xf32> to vector<8x128xf32>
    %34 = arith.mulf %14, %33 : vector<8x128xf32>
    %35 = arith.addf %32, %34 : vector<8x128xf32>
    %c0_11 = arith.constant 0 : index
    %c0_12 = arith.constant 0 : index
    %36 = vector.load %arg5[%c0_11, %c0_12] : memref<8x128xf32, #tpu.memory_space<vmem>>, vector<8x128xf32>
    tpu.vector_store %arg5[%c0_11, %c0_12], %35 {strides = array<i32>} : memref<8x128xf32, #tpu.memory_space<vmem>>, vector<8x128xf32>,
    %c0_13 = arith.constant 0 : index
    %c0_14 = arith.constant 0 : index
    %37 = vector.load %arg6[%c0_13, %c0_14] : memref<8x128xf32, #tpu.memory_space<vmem>>, vector<8x128xf32>
    %38 = arith.addf %37, %19 : vector<8x128xf32>
    %c0_15 = arith.constant 0 : index
    %c0_16 = arith.constant 0 : index
    %39 = vector.load %arg6[%c0_15, %c0_16] : memref<8x128xf32, #tpu.memory_space<vmem>>, vector<8x128xf32>
    tpu.vector_store %arg6[%c0_15, %c0_16], %38 {strides = array<i32>} : memref<8x128xf32, #tpu.memory_space<vmem>>, vector<8x128xf32>,
    %c0_i32_17 = arith.constant 0 : i32
    %40 = arith.cmpi eq, %arg0, %c0_i32_17 : i32
    %41 = arith.extui %40 : i1 to i32
    %c0_i32_18 = arith.constant 0 : i32
    %42 = arith.cmpi ne, %41, %c0_i32_18 : i32
    scf.if %42 {
      %c0_19 = arith.constant 0 : index
      %c0_20 = arith.constant 0 : index
      %43 = vector.load %arg4[%c0_19, %c0_20] : memref<8x128xf32, #tpu.memory_space<vmem>>, vector<8x128xf32>
      %cst_21 = arith.constant dense<0.000000e+00> : vector<8xf32>
      %44 = vector.multi_reduction <add>, %43, %cst_21 [1] : vector<8x128xf32> to vector<8xf32>
      %45 = vector.shape_cast %44 : vector<8xf32> to vector<8x1xf32>
      %c0_22 = arith.constant 0 : index
      %c0_23 = arith.constant 0 : index
      %46 = vector.load %arg5[%c0_22, %c0_23] : memref<8x128xf32, #tpu.memory_space<vmem>>, vector<8x128xf32>
      %cst_24 = arith.constant dense<0.000000e+00> : vector<8xf32>
      %47 = vector.multi_reduction <add>, %46, %cst_24 [1] : vector<8x128xf32> to vector<8xf32>
      %48 = vector.shape_cast %47 : vector<8xf32> to vector<8x1xf32>
      %c0_25 = arith.constant 0 : index
      %c0_26 = arith.constant 0 : index
      %49 = vector.load %arg6[%c0_25, %c0_26] : memref<8x128xf32, #tpu.memory_space<vmem>>, vector<8x128xf32>
      %cst_27 = arith.constant dense<0.000000e+00> : vector<8xf32>
      %50 = vector.multi_reduction <add>, %49, %cst_27 [1] : vector<8x128xf32> to vector<8xf32>
      %51 = vector.shape_cast %50 : vector<8xf32> to vector<8x1xf32>
      %cst_28 = arith.constant 1.000000e-07 : f32
      %52 = vector.broadcast %cst_28 : f32 to vector<8x1xf32>
      %53 = arith.addf %48, %52 : vector<8x1xf32>
      %54 = arith.divf %45, %53 : vector<8x1xf32>
      %cst_29 = arith.constant 1.000000e-07 : f32
      %55 = vector.broadcast %cst_29 : f32 to vector<8x1xf32>
      %56 = arith.addf %51, %55 : vector<8x1xf32>
      %57 = arith.divf %45, %56 : vector<8x1xf32>
      %58 = arith.mulf %54, %57 : vector<8x1xf32>
      %cst_30 = arith.constant 2.000000e+00 : f32
      %59 = vector.broadcast %cst_30 : f32 to vector<8x1xf32>
      %60 = arith.mulf %59, %58 : vector<8x1xf32>
      %61 = arith.addf %54, %57 : vector<8x1xf32>
      %cst_31 = arith.constant 1.000000e-07 : f32
      %62 = vector.broadcast %cst_31 : f32 to vector<8x1xf32>
      %63 = arith.addf %61, %62 : vector<8x1xf32>
      %64 = arith.divf %60, %63 : vector<8x1xf32>
      %cst_32 = arith.constant 1.000000e-07 : f32
      %cst_33 = arith.constant 0.99999988 : f32
      %65 = vector.broadcast %cst_32 : f32 to vector<8x1xf32>
      %66 = arith.maximumf %65, %64 : vector<8x1xf32>
      %67 = vector.broadcast %cst_33 : f32 to vector<8x1xf32>
      %68 = arith.minimumf %67, %66 : vector<8x1xf32>
      %69 = tpu.iota {dimensions = array<i32: 0>} : vector<8x1xi32>
      %c3_i32 = arith.constant 3 : i32
      %70 = vector.broadcast %c3_i32 : i32 to vector<8x1xi32>
      %71 = arith.cmpi slt, %69, %70 : vector<8x1xi32>
      %72 = arith.extui %71 : vector<8x1xi1> to vector<8x1xi32>
      %73 = arith.sitofp %72 : vector<8x1xi32> to vector<8x1xf32>
      %74 = arith.mulf %68, %73 : vector<8x1xf32>
      %75 = vector.shape_cast %74 : vector<8x1xf32> to vector<1x8x1xf32>
      %cst_34 = arith.constant dense<0.000000e+00> : vector<1xf32>
      %76 = vector.multi_reduction <add>, %75, %cst_34 [1, 2] : vector<1x8x1xf32> to vector<1xf32>
      %77 = vector.shape_cast %76 : vector<1xf32> to vector<1x1x1xf32>
      %78 = vector.extract %77[0, 0, 0] : f32 from vector<1x1x1xf32>
      %cst_35 = arith.constant 3.000000e+00 : f32
      %79 = arith.divf %78, %cst_35 : f32
      %cst_36 = arith.constant 1.000000e+00 : f32
      %80 = arith.subf %cst_36, %79 : f32
      %c0_37 = arith.constant 0 : index
      %c0_38 = arith.constant 0 : index
      %81 = memref.load %arg3[%c0_37, %c0_38] : memref<1x1xf32, #tpu.memory_space<smem>>
      memref.store %80, %arg3[%c0_37, %c0_38] : memref<1x1xf32, #tpu.memory_space<smem>>
    } else {
    }
    return
  }
  func.func @transform_0(%arg0: i32) -> (i32, i32) {
    %c0_i32 = arith.constant 0 : i32
    %c0_i32_0 = arith.constant 0 : i32
    return %c0_i32, %arg0 : i32, i32
  }
  func.func @transform_1(%arg0: i32) -> (i32, i32) {
    %c0_i32 = arith.constant 0 : i32
    %c0_i32_0 = arith.constant 0 : i32
    return %c0_i32, %arg0 : i32, i32
  }
  func.func @transform_2(%arg0: i32) -> (i32, i32) {
    %c0_i32 = arith.constant 0 : i32
    %c0_i32_0 = arith.constant 0 : i32
    %c0_i32_1 = arith.constant 0 : i32
    return %c0_i32, %c0_i32_0 : i32, i32
  }
}

</mosaic_0001>

<bundles_post_ra>
// kernel: tpu_custom_call.1
= control target key start
LH: loop header
LB: loop body
LE: loop exit
PB: predicated region body
PF: predicated region fallthrough
CT: control target
= control target key end

     0   :  { %7 = vsyncpa [#allocation6], 0  ;;  %s242_s0 = inlined_call_operand.hbm [shape: f32[8,128], index: 0, kind: input, shape index: {}]   ;;  %s243_s1 = inlined_call_operand.vmem [shape: s32[1,128], index: 1, kind: input, shape index: {}]   ;;  %s244_s2 = inlined_call_operand.hbm [shape: f32[1,1], index: 2, kind: output, shape index: {}]  }
   0x1   :  { %8 = vsyncpa [#allocation7], 0  ;;  %s197_s9 = smov [#allocation5]   ;;  %s161_s13 = scalar_lea.hbm %s242_s0, 128 }
   0x2   :  { %s15_s10 = sshll.u32 %s197_s9, 4  ;;  %p162_p0 = scmp.ne.s32.totalorder %s242_s0, %s161_s13  ;;  %s16_s10 = int_to_ptr.vmem [resolvable:$true] %s15_s10 }
   0x3   :  { %p165_p1 = scmp.lt.u32.totalorder %s161_s13, %s242_s0 }
   0x5   :  { %p167_p2 = pnand %p165_p1, %p162_p0 }
   0x7   :  { %170 = shalt.err (!%p167_p2)
}
   0x8   :  { %s171_s18 = scalar_lea.vmem %s16_s10, 128  ;;  %p176_p4 = scmp.lt.s32.totalorder %s16_s10, %s16_s10 }
   0x9   :  { %p172_p3 = scmp.ne.s32.totalorder %s16_s10, %s171_s18  ;;  %p177_p5 = scmp.lt.s32.totalorder %s171_s18, %s171_s18 }
   0xb   :  { %p178_p6 = por %p177_p5, %p176_p4 }
   0xd   :  { %p179_p7 = pnand %p178_p6, %p172_p3 }
   0xf   :  { %182 = shalt.err (!%p179_p7)
}
  0x10   :  { %18 = dma.hbm_to_vmem [thread:$0]  %s242_s0, 128, %s16_s10, [#allocation6]  }
  0x11   :  { %193 = dma.done.wait [#allocation6], 128  }
  0x12   :  { %194 = vsyncadd [#allocation6], 4294967168  ;;  %v33_v0 = vld [vmem:[#allocation5] sm:$0xff]  ;;  %v52_v16 = vlaneseq  ;;  %v198_v21 = vmov 0.0   ;;  %vm110_vm3 = vcmask 7168   ;;  %s183_s26 = scalar_lea.hbm %s244_s2, 16 }
  0x13   :  { %v35_v1 = vrot.slane %v33_v0, 4  ;;  %v141_v19 = vld [vmem:[%s243_s1] ss:$0 sm:$0xff]  ;;  %p184_p8 = scmp.ne.s32.totalorder %s244_s2, %s183_s26  ;;  %p187_p9 = scmp.lt.u32.totalorder %s183_s26, %s244_s2 }
  0x14   :  { %v62_v17 = vand.u32 127, %v52_v16  ;;  %v53_v18 = vshrl.u32 %v52_v16, 7 }
  0x15   :  { %v36_v2 = vmax.f32 %v33_v0, %v35_v1  ;;  %p189_p10 = pnand %p187_p9, %p184_p8 }
  0x16   :  { %vm66_vm0 = vcmp.lt.s32.totalorder %v62_v17, 16  ;;  %vm58_vm1 = vcmp.eq.s32.totalorder %v141_v19, %v53_v18  ;;  %vm106_vm2 = vcmp.lt.s32.totalorder %v53_v18, 3 }
  0x17   :  { %v37_v3 = vrot.slane %v36_v2, 2  ;;  %v143_v22 = vsel %vm66_vm0, 1.0, %v198_v21  ;;  %v142_v24 = vsel %vm58_vm1, 1.0, %v198_v21  ;;  %v144_v43 = vsel %vm106_vm2, 1.0, %v198_v21 }
  0x19   :  { %v38_v4 = vmax.f32 %v36_v2, %v37_v3 }
  0x1b   :  { %v39_v5 = vrot.slane %v38_v4, 1 }
  0x1d   :  { %v40_v6 = vmax.f32 %v38_v4, %v39_v5 }
  0x1f   :  { %v41_v7 = vsub.f32 %v33_v0, %v40_v6 }
  0x21   :  { %v42_v8 = vmul.f32 1.442695, %v41_v7 }
  0x23   :  { %151 = vpow2.f32 %v42_v8 }
  0x2d   :  { %v152_v9 = vpop.eup %151 }
  0x2e   :  { %v44_v10 = vrot.slane %v152_v9, 4 }
  0x30   :  { %v45_v11 = vadd.f32 %v152_v9, %v44_v10 }
  0x32   :  { %v46_v12 = vrot.slane %v45_v11, 2 }
  0x34   :  { %v47_v13 = vadd.f32 %v46_v12, %v45_v11 }
  0x36   :  { %v48_v14 = vrot.slane %v47_v13, 1 }
  0x38   :  { %v49_v15 = vadd.f32 %v48_v14, %v47_v13 }
  0x3a   :  { %153 = vrcp.f32 %v49_v15 }
  0x44   :  { %v154_v20 = vpop.eup %153 }
  0x45   :  { %v51_v23 = vmul.f32 %v154_v20, %v152_v9 }
  0x47   :  { %v74_v25 = vmul.f32 %v143_v22, %v51_v23  ;;  %v70_v26 = vmul.f32 %v142_v24, %v51_v23 }
  0x49   :  { %87 = vadd.xlane.f32.xlu0 %v74_v25  ;;  %84 = vadd.xlane.f32.xlu1 %v70_v26 }
  0x4d   :  { %90 = vadd.xlane.f32.xlu0 %v142_v24 }
  0xd6   :  { %v88_v27 = vpop.xlane.xlu0 %87  ;;  %v85_v32 = vpop.xlane.xlu1 %84 }
  0xd7   :  { %v92_v28 = vadd.f32 1e-07, %v88_v27 }
  0xd9   :  { %155 = vrcp.f32 %v92_v28 }
  0xda   :  { %v91_v29 = vpop.xlane.xlu0 %90 }
  0xdb   :  { %v95_v30 = vadd.f32 1e-07, %v91_v29 }
  0xdd   :  { %157 = vrcp.f32 %v95_v30 }
  0xe3   :  { %v156_v31 = vpop.eup %155 }
  0xe4   :  { %v94_v34 = vmul.f32 %v156_v31, %v85_v32 }
  0xe7   :  { %v158_v33 = vpop.eup %157 }
  0xe8   :  { %v97_v35 = vmul.f32 %v158_v33, %v85_v32 }
  0xea   :  { %v100_v36 = vadd.f32 %v97_v35, %v94_v34  ;;  %v98_v38 = vmul.f32 %v97_v35, %v94_v34 }
  0xec   :  { %v101_v37 = vadd.f32 1e-07, %v100_v36  ;;  %v99_v39 = vmul.f32 2.0, %v98_v38 }
  0xee   :  { %159 = vrcp.f32 %v101_v37 }
  0xf8   :  { %v160_v40 = vpop.eup %159 }
  0xf9   :  { %v103_v41 = vmul.f32 %v160_v40, %v99_v39 }
  0xfb   :  { %v104_v42 = vmax.f32 %v103_v41, 1e-07 }
  0xfd   :  { %v105_v44 = vmin.f32 %v104_v42, 0.9999999 }
  0xff   :  { %v109_v45 = vmul.f32 %v144_v43, %v105_v44 }
 0x101   :  { %v111_v46 = vsel %vm110_vm3, %v109_v45, 0.0 }
 0x102   :  { %112 = vadd.xlane.f32.xlu1 %v111_v46 }
 0x18f   :  { %v113_v47 = vpop.xlane.xlu1 %112 }
 0x190   :  { %v114_v48 = vrot.slane %v113_v47, 4 }
 0x192   :  { %v115_v49 = vadd.f32 %v114_v48, %v113_v47 }
 0x194   :  { %v116_v50 = vrot.slane %v115_v49, 2 }
 0x196   :  { %v117_v51 = vadd.f32 %v116_v50, %v115_v49 }
 0x198   :  { %v118_v52 = vrot.slane %v117_v51, 1 }
 0x19a   :  { %v119_v53 = vadd.f32 %v118_v52, %v117_v51 }
 0x19c   :  { %145 = vpush %v119_v53 }
 0x1cd   :  { %s146_s1 = spop %145 }
 0x1ce   :  { %s123_s22 = smul.f32 0.33333334, %s146_s1 }
 0x1d0   :  { %s124_s23 = ssub.f32 1.0, %s123_s22 }
 0x1d2   :  { %126 = sst [smem:[#allocation8]] %s124_s23 }
 0x1d3   :  { %192 = shalt.err (!%p189_p10)
}
 0x1d4   :  { %s199_s3 = smov [#allocation8]  }
 0x1d5   :  { %134 = dma.smem_to_hbm %s199_s3, 16, %s244_s2, [#allocation7]  }
 0x1d6   :  { %195 = dma.done.wait [#allocation7], 16  }
 0x1d7   :  { %196 = vsyncadd [#allocation7], 4294967280 }
 0x1d8   :  { %138 = sfence }
 0x1d9   :  { %139 = vsyncpa [#allocation6], 1 }
 0x1da   :  { %140 = vsyncpa [#allocation7], 1 }

</bundles_post_ra>
